<compile_context>
chip_gen: v6e
topology: v6e:2x2x1
jax: 0.10.0
libtpu: 0.0.40
codegen_flags: <defaults>
</compile_context>

<pallas_src>
import functools
import math

import jax
import jax.numpy as jnp
from jax.experimental import pallas as pl
from jax.experimental.pallas import tpu as pltpu


_TARGET_STEPS = 8            # aim for this many grid steps (pipelining + v7x 2 TCs)
_MIN_TILE_ELEMS = 256 * 1024  # don't split tiles below ~1 MiB (f32)


# --------------------------------------------------------------------------
# sizing helpers
# --------------------------------------------------------------------------
def _round_down(x, m):
    return (x // m) * m


def _round_up(x, m):
    return -(-x // m) * m


def _sublane(dtype):
    """Native sublane packing (rows per 32-bit sublane group): 8 f32, 16 bf16, 32 int8."""
    return max(8, 32 // max(1, jnp.dtype(dtype).itemsize))


def _vmem_ceiling_bytes():
    """Per-generation scoped-VMEM ceiling (headroom below physical VMEM)."""
    cap = 64 << 20
    try:
        info = pltpu.get_tpu_info()
        cap = int(getattr(info, "vmem_capacity_bytes", cap))
    except Exception:
        pass
    # 8 MiB headroom below physical; never ask for more than 100 MiB.
    return max(16 << 20, min(cap - (8 << 20), 100 << 20))


def _elems_budget(vmem_ceiling, itemsize, override=None):
    """Max elements per tile.  Live VMEM per tile element (worst case):
    2x dbl-buffered input + 2x dbl-buffered output (itemsize each) plus ~16 B
    of f32 intermediates (upcast, pow term, scaled result)."""
    bytes_per_elem = 4 * itemsize + 16
    budget = max(4096, (vmem_ceiling - (4 << 20)) // bytes_per_elem)
    if override is not None:
        budget = max(256, min(budget, int(override)))
    return int(budget)


def _vmem_request(tile_elems, itemsize, ceiling):
    """Scoped-VMEM request sized to what the chosen tile actually needs."""
    need = tile_elems * (4 * itemsize + 16) + (8 << 20)
    return int(min(ceiling, max(16 << 20, need)))


def _pick_parallel_tile(total, per_item_cost, budget, quantum):
    """Tile size along an independent (row) axis: as big as the VMEM budget
    allows, capped so ~_TARGET_STEPS blocks exist, never below ~_MIN_TILE_ELEMS
    per tile.  `quantum` is the dtype-aware sublane pack."""
    if total <= quantum:
        return total                                   # full-dim block (legal)
    by_budget = max(quantum, _round_down(budget // max(1, per_item_cost), quantum))
    min_rows = max(quantum,
                   _round_up(-(-_MIN_TILE_ELEMS // max(1, per_item_cost)), quantum))
    want_blocks = min(_TARGET_STEPS, max(1, -(-total // min_rows)))
    by_steps = max(quantum, _round_up(-(-total // want_blocks), quantum))
    tile = min(by_budget, max(by_steps, min_rows))
    return max(quantum, min(tile, _round_down(total, quantum)))


# --------------------------------------------------------------------------
# math helpers (f32)
# --------------------------------------------------------------------------
def _pow_term(x, p):
    """|x|**p without exp/log for small integer p."""
    if p == 2.0:
        return x * x
    if p == 1.0:
        return jnp.abs(x)
    ip = int(p)
    if float(ip) == p and 1 <= ip <= 4:
        a = jnp.abs(x)
        r = a
        for _ in range(ip - 1):
            r = r * a
        return r
    return jnp.abs(x) ** p


def _inv_from_powsum(ss, p, eps):
    """1 / max((sum |x|^p)^(1/p), eps), given ss = sum |x|^p (f32)."""
    if p == 2.0:
        # min(rsqrt(ss), 1/eps) == 1 / max(sqrt(ss), eps) for ss >= 0.
        return jnp.minimum(jax.lax.rsqrt(ss), 1.0 / eps)
    if p == 1.0:
        return 1.0 / jnp.maximum(ss, eps)
    return 1.0 / jnp.maximum(ss ** (1.0 / p), eps)


# --------------------------------------------------------------------------
# single-pass kernels (normalized axis lives fully inside the block)
# --------------------------------------------------------------------------
def _lane_kernel(x_ref, o_ref, *, p, eps):
    # (tile_rows, K): reduce along the lane (last) axis.
    x = x_ref[...].astype(jnp.float32)
    ss = jnp.sum(_pow_term(x, p), axis=-1, keepdims=True)
    o_ref[...] = (x * _inv_from_powsum(ss, p, eps)).astype(o_ref.dtype)


def _sublane_kernel(x_ref, o_ref, *, p, eps):
    # (tile_n, K, tile_post): reduce along axis 1 (sublane axis), post lane-dense.
    x = x_ref[...].astype(jnp.float32)
    ss = jnp.sum(_pow_term(x, p), axis=1, keepdims=True)
    o_ref[...] = (x * _inv_from_powsum(ss, p, eps)).astype(o_ref.dtype)


def _flat_kernel(x_ref, o_ref, *, p, eps, K, post):
    # (tile_rows, K*post) contiguous view of (rows, K, post): reduce over K by
    # summing K static lane slices — keeps loads/stores lane-dense for small K.
    x = x_ref[...].astype(jnp.float32)
    ss = _pow_term(x[:, 0:post], p)
    for k in range(1, K):
        ss = ss + _pow_term(x[:, k * post:(k + 1) * post], p)
    inv = _inv_from_powsum(ss, p, eps)                    # (tile_rows, post)
    # flat index j = k*post + q scales by inv[:, q]  ==  tile(inv, (1, K))
    o_ref[...] = (x * jnp.tile(inv, (1, K))).astype(o_ref.dtype)


# --------------------------------------------------------------------------
# two-pass kernels (K tiled over an "arbitrary" grid axis; VMEM bounded)
# --------------------------------------------------------------------------
def _powsum_lane_kernel(x_ref, s_ref, acc_ref, *, p, K, tile_k):
    k = pl.program_id(1)

    @pl.when(k == 0)
    def _():
        acc_ref[...] = jnp.zeros_like(acc_ref)

    x = x_ref[...].astype(jnp.float32)
    if K % tile_k:  # ragged last K block: padded contents are unspecified
        col = jax.lax.broadcasted_iota(jnp.int32, x.shape, 1) + k * tile_k
        x = jnp.where(col < K, x, 0.0)
    acc_ref[...] += jnp.sum(_pow_term(x, p), axis=-1, keepdims=True)

    @pl.when(k == pl.num_programs(1) - 1)
    def _():
        s_ref[...] = acc_ref[...]


def _scale_lane_kernel(x_ref, s_ref, o_ref, *, p, eps):
    x = x_ref[...].astype(jnp.float32)
    o_ref[...] = (x * _inv_from_powsum(s_ref[...], p, eps)).astype(o_ref.dtype)


def _powsum_3d_kernel(x_ref, s_ref, acc_ref, *, p, K, tile_k):
    k = pl.program_id(2)

    @pl.when(k == 0)
    def _():
        acc_ref[...] = jnp.zeros_like(acc_ref)

    x = x_ref[...].astype(jnp.float32)
    if K % tile_k:  # mask the ragged trailing K block
        kid = jax.lax.broadcasted_iota(jnp.int32, (x.shape[1], x.shape[2]), 0) + k * tile_k
        x = jnp.where((kid < K)[None, :, :], x, 0.0)
    acc_ref[...] += jnp.sum(_pow_term(x, p), axis=1, keepdims=True)

    @pl.when(k == pl.num_programs(2) - 1)
    def _():
        s_ref[...] = acc_ref[...]


def _scale_3d_kernel(x_ref, s_ref, o_ref, *, p, eps):
    x = x_ref[...].astype(jnp.float32)
    o_ref[...] = (x * _inv_from_powsum(s_ref[...], p, eps)).astype(o_ref.dtype)


# --------------------------------------------------------------------------
# wrappers
# --------------------------------------------------------------------------
def _normalize_last_axis(x2, p, eps, budget, sub, itemsize, ceiling):
    rows, K = x2.shape
    if min(rows, sub) * K <= budget:
        tile_rows = _pick_parallel_tile(rows, K, budget, sub)
        grid = (pl.cdiv(rows, tile_rows),)
        return pl.pallas_call(
            functools.partial(_lane_kernel, p=p, eps=eps),
            out_shape=jax.ShapeDtypeStruct((rows, K), x2.dtype),
            grid_spec=pltpu.PrefetchScalarGridSpec(
                num_scalar_prefetch=0,
                grid=grid,
                in_specs=[pl.BlockSpec((tile_rows, K), lambda i: (i, 0))],
                out_specs=pl.BlockSpec((tile_rows, K), lambda i: (i, 0)),
            ),
            compiler_params=pltpu.CompilerParams(
                dimension_semantics=("parallel",),
                vmem_limit_bytes=_vmem_request(tile_rows * K, itemsize, ceiling),
            ),
        )(x2)
    return _normalize_last_axis_two_pass(x2, p, eps, budget, sub, itemsize, ceiling)


def _normalize_last_axis_two_pass(x2, p, eps, budget, sub, itemsize, ceiling):
    rows, K = x2.shape
    tile_rows = rows if rows < sub else sub
    # widen the row tile a bit if the budget allows (amortizes per-step cost)
    while tile_rows < rows and tile_rows < 4 * sub and (2 * tile_rows) * 128 <= budget:
        tile_rows *= 2
    max_k = max(128, _round_down(budget // max(1, tile_rows), 128))
    tile_k = K if K <= max_k else max_k
    grid = (pl.cdiv(rows, tile_rows), pl.cdiv(K, tile_k))
    vmem = _vmem_request(tile_rows * tile_k, itemsize, ceiling)

    ssum = pl.pallas_call(
        functools.partial(_powsum_lane_kernel, p=p, K=K, tile_k=tile_k),
        out_shape=jax.ShapeDtypeStruct((rows, 1), jnp.float32),
        grid_spec=pltpu.PrefetchScalarGridSpec(
            num_scalar_prefetch=0,
            grid=grid,
            in_specs=[pl.BlockSpec((tile_rows, tile_k), lambda i, k: (i, k))],
            out_specs=pl.BlockSpec((tile_rows, 1), lambda i, k: (i, 0)),
            scratch_shapes=[pltpu.VMEM((tile_rows, 1), jnp.float32)],
        ),
        compiler_params=pltpu.CompilerParams(
            dimension_semantics=("parallel", "arbitrary"),
            vmem_limit_bytes=vmem,
        ),
    )(x2)

    return pl.pallas_call(
        functools.partial(_scale_lane_kernel, p=p, eps=eps),
        out_shape=jax.ShapeDtypeStruct((rows, K), x2.dtype),
        grid_spec=pltpu.PrefetchScalarGridSpec(
            num_scalar_prefetch=0,
            grid=grid,
            in_specs=[pl.BlockSpec((tile_rows, tile_k), lambda i, k: (i, k)),
                      pl.BlockSpec((tile_rows, 1), lambda i, k: (i, 0))],
            out_specs=pl.BlockSpec((tile_rows, tile_k), lambda i, k: (i, k)),
        ),
        compiler_params=pltpu.CompilerParams(
            dimension_semantics=("parallel", "parallel"),
            vmem_limit_bytes=vmem,
        ),
    )(x2, ssum)


def _normalize_mid_axis(x3, p, eps, budget, sub, itemsize, ceiling):
    pre, K, post = x3.shape

    # Small-K / narrow-post: contiguous 2D view (lane-dense, no sublane waste).
    if (K < sub or post < 128) and K <= 64 and min(pre, sub) * K * post <= budget:
        x2 = x3.reshape(pre, K * post)
        tile_rows = _pick_parallel_tile(pre, K * post, budget, sub)
        grid = (pl.cdiv(pre, tile_rows),)
        out2 = pl.pallas_call(
            functools.partial(_flat_kernel, p=p, eps=eps, K=K, post=post),
            out_shape=jax.ShapeDtypeStruct((pre, K * post), x2.dtype),
            grid_spec=pltpu.PrefetchScalarGridSpec(
                num_scalar_prefetch=0,
                grid=grid,
                in_specs=[pl.BlockSpec((tile_rows, K * post), lambda i: (i, 0))],
                out_specs=pl.BlockSpec((tile_rows, K * post), lambda i: (i, 0)),
            ),
            compiler_params=pltpu.CompilerParams(
                dimension_semantics=("parallel",),
                vmem_limit_bytes=_vmem_request(tile_rows * K * post, itemsize, ceiling),
            ),
        )(x2)
        return out2.reshape(pre, K, post)

    # Single-pass 3D path: K fully in-block on the sublane axis, post lane-dense.
    if K * min(post, 128) <= budget:
        total = pre * K * post
        want = max(-(-total // budget),
                   min(_TARGET_STEPS, max(1, total // _MIN_TILE_ELEMS)))
        bp = max(1, min(pre, want))                       # blocks along pre
        tile_n = -(-pre // bp)
        bq = 1
        if post > 128:
            bq = max(1, min(post // 128, -(-want // bp)))  # extra blocks along post
        tile_post = post if bq <= 1 else max(128, _round_up(-(-post // bq), 128))
        # enforce the VMEM budget
        tile_n = max(1, min(tile_n, budget // (K * tile_post)))
        if tile_n * K * tile_post > budget and post > 128:
            tile_post = max(128, _round_down(budget // K, 128))
        grid = (pl.cdiv(pre, tile_n), pl.cdiv(post, tile_post))
        return pl.pallas_call(
            functools.partial(_sublane_kernel, p=p, eps=eps),
            out_shape=jax.ShapeDtypeStruct((pre, K, post), x3.dtype),
            grid_spec=pltpu.PrefetchScalarGridSpec(
                num_scalar_prefetch=0,
                grid=grid,
                in_specs=[pl.BlockSpec((tile_n, K, tile_post),
                                       lambda i, j: (i, 0, j))],
                out_specs=pl.BlockSpec((tile_n, K, tile_post),
                                       lambda i, j: (i, 0, j)),
            ),
            compiler_params=pltpu.CompilerParams(
                dimension_semantics=("parallel", "parallel"),
                vmem_limit_bytes=_vmem_request(tile_n * K * tile_post, itemsize, ceiling),
            ),
        )(x3)

    # Very large K: two-pass (bounded VMEM regardless of K).
    return _normalize_mid_axis_two_pass(x3, p, eps, budget, sub, itemsize, ceiling)


def _normalize_mid_axis_two_pass(x3, p, eps, budget, sub, itemsize, ceiling):
    pre, K, post = x3.shape
    tile_post = post if post <= 128 else min(_round_down(post, 128), 256)
    max_k = max(sub, _round_down(budget // max(1, tile_post), sub))
    tile_k = K if K <= max_k else max_k
    grid = (pre, pl.cdiv(post, tile_post), pl.cdiv(K, tile_k))
    vmem = _vmem_request(tile_k * tile_post, itemsize, ceiling)

    ssum = pl.pallas_call(
        functools.partial(_powsum_3d_kernel, p=p, K=K, tile_k=tile_k),
        out_shape=jax.ShapeDtypeStruct((pre, 1, post), jnp.float32),
        grid_spec=pltpu.PrefetchScalarGridSpec(
            num_scalar_prefetch=0,
            grid=grid,
            in_specs=[pl.BlockSpec((1, tile_k, tile_post),
                                   lambda i, j, k: (i, k, j))],
            out_specs=pl.BlockSpec((1, 1, tile_post), lambda i, j, k: (i, 0, j)),
            scratch_shapes=[pltpu.VMEM((1, 1, tile_post), jnp.float32)],
        ),
        compiler_params=pltpu.CompilerParams(
            dimension_semantics=("parallel", "parallel", "arbitrary"),
            vmem_limit_bytes=vmem,
        ),
    )(x3)

    return pl.pallas_call(
        functools.partial(_scale_3d_kernel, p=p, eps=eps),
        out_shape=jax.ShapeDtypeStruct((pre, K, post), x3.dtype),
        grid_spec=pltpu.PrefetchScalarGridSpec(
            num_scalar_prefetch=0,
            grid=grid,
            in_specs=[pl.BlockSpec((1, tile_k, tile_post),
                                   lambda i, j, k: (i, k, j)),
                      pl.BlockSpec((1, 1, tile_post), lambda i, j, k: (i, 0, j))],
            out_specs=pl.BlockSpec((1, tile_k, tile_post),
                                   lambda i, j, k: (i, k, j)),
        ),
        compiler_params=pltpu.CompilerParams(
            dimension_semantics=("parallel", "parallel", "parallel"),
            vmem_limit_bytes=vmem,
        ),
    )(x3, ssum)


def pallas_normalize(x, p=2.0, dim=1, eps=1e-12, *, max_tile_elems=None):
    """Equivalent of torch.nn.functional.normalize(x, p=p, dim=dim, eps=eps)."""
    p = float(p)
    eps = float(eps)
    ndim = x.ndim
    dim = dim % ndim
    shape = x.shape
    K = int(shape[dim])
    pre = int(math.prod(shape[:dim])) if dim > 0 else 1
    post = int(math.prod(shape[dim + 1:])) if dim < ndim - 1 else 1

    itemsize = jnp.dtype(x.dtype).itemsize
    sub = _sublane(x.dtype)
    ceiling = _vmem_ceiling_bytes()
    budget = _elems_budget(ceiling, itemsize, max_tile_elems)

    if post == 1:
        out = _normalize_last_axis(x.reshape(pre, K), p, eps, budget, sub,
                                   itemsize, ceiling)
    else:
        out = _normalize_mid_axis(x.reshape(pre, K, post), p, eps, budget, sub,
                                  itemsize, ceiling)
    return out.reshape(shape)


class Normalization:
    """Pallas equivalent of the PyTorch `normalization` module."""

    def __init__(self, p, dim):
        self.p = p
        self.dim = dim

    def __call__(self, x):
        return pallas_normalize(x, p=self.p, dim=self.dim)


def _reference_normalize(x, p=2.0, dim=1, eps=1e-12):
    xf = x.astype(jnp.float32)
    norm = jnp.sum(jnp.abs(xf) ** p, axis=dim, keepdims=True) ** (1.0 / p)
    return (xf / jnp.maximum(norm, eps)).astype(x.dtype)


if __name__ == "__main__":
    key = jax.random.PRNGKey(0)
    ks = jax.random.split(key, 8)

    # 1) CCVPE usage: NCHW, p=2, dim=1 (small-K flat path, lane-dense stores).
    mod = Normalization(p=2.0, dim=1)
    x = jax.random.normal(ks[0], (2, 4, 16, 16), dtype=jnp.float32)
    out = jax.block_until_ready(mod(x))
    ref = _reference_normalize(x, p=2.0, dim=1)
    assert out.shape == x.shape and out.dtype == x.dtype
    assert jnp.allclose(out, ref, atol=1e-5, rtol=1e-5), "mismatch (NCHW dim=1)"

    # 2) last-axis lane-reduce path.
    y = jax.random.normal(ks[1], (16, 32), dtype=jnp.float32)
    out_y = jax.block_until_ready(pallas_normalize(y, p=2.0, dim=-1))
    assert jnp.allclose(out_y, _reference_normalize(y, p=2.0, dim=-1),
                        atol=1e-5, rtol=1e-5), "mismatch (dim=-1)"

    # 3) single-pass 3D path (K on sublanes, post lane-dense).
    z = jax.random.normal(ks[2], (4, 16, 8, 32), dtype=jnp.float32)
    out_z = jax.block_until_ready(pallas_normalize(z, p=2.0, dim=1))
    assert jnp.allclose(out_z, _reference_normalize(z, p=2.0, dim=1),
                        atol=1e-5, rtol=1e-5), "mismatch (3D path)"

    # 4) two-pass K-tiled lane path (forced via a tiny tile budget), ragged K.
    w = jax.random.normal(ks[3], (8, 300), dtype=jnp.float32)
    out_w = jax.block_until_ready(
        pallas_normalize(w, p=2.0, dim=-1, max_tile_elems=1024))
    assert jnp.allclose(out_w, _reference_normalize(w, p=2.0, dim=-1),
                        atol=1e-5, rtol=1e-5), "mismatch (two-pass lane)"

    # 5) two-pass K-tiled mid-axis path (forced), ragged K tiles.
    v = jax.random.normal(ks[4], (2, 200, 128), dtype=jnp.float32)
    out_v = jax.block_until_ready(
        pallas_normalize(v, p=2.0, dim=1, max_tile_elems=8192))
    assert jnp.allclose(out_v, _reference_normalize(v, p=2.0, dim=1),
                        atol=1e-5, rtol=1e-5), "mismatch (two-pass 3D)"

    # 6) non-default norm order (p=1) on the NCHW shape.
    out_p1 = jax.block_until_ready(pallas_normalize(x, p=1.0, dim=1))
    assert jnp.allclose(out_p1, _reference_normalize(x, p=1.0, dim=1),
                        atol=1e-5, rtol=1e-5), "mismatch (p=1)"

    print("KERNEL_OK")
</pallas_src>

<mosaic_0001>
module attributes {stable_mosaic.version = 11 : i64} {
  func.func @_flat_kernel(%arg0: i32, %arg1: memref<2x1024xf32, #tpu.memory_space<vmem>>, %arg2: memref<2x1024xf32, #tpu.memory_space<vmem>>) attributes {dimension_semantics = [#tpu.dimension_semantics<parallel>], iteration_bounds = array<i64: 1>, scalar_prefetch = 0 : i64, scratch_operands = 0 : i64, tpu.core_type = #tpu.core_type<tc>, window_params = [{transform_indices = @transform_0, window_bounds = array<i64: 2, 1024>}, {transform_indices = @transform_1, window_bounds = array<i64: 2, 1024>}]} {
    %c0 = arith.constant 0 : index
    %c0_0 = arith.constant 0 : index
    %0 = vector.load %arg1[%c0, %c0_0] : memref<2x1024xf32, #tpu.memory_space<vmem>>, vector<2x1024xf32>
    %1 = vector.extract_strided_slice %0 {offsets = [0, 0], sizes = [2, 256], strides = [1, 1]} : vector<2x1024xf32> to vector<2x256xf32>
    %2 = arith.mulf %1, %1 : vector<2x256xf32>
    %3 = vector.extract_strided_slice %0 {offsets = [0, 256], sizes = [2, 256], strides = [1, 1]} : vector<2x1024xf32> to vector<2x256xf32>
    %4 = arith.mulf %3, %3 : vector<2x256xf32>
    %5 = arith.addf %2, %4 : vector<2x256xf32>
    %6 = vector.extract_strided_slice %0 {offsets = [0, 512], sizes = [2, 256], strides = [1, 1]} : vector<2x1024xf32> to vector<2x256xf32>
    %7 = arith.mulf %6, %6 : vector<2x256xf32>
    %8 = arith.addf %5, %7 : vector<2x256xf32>
    %9 = vector.extract_strided_slice %0 {offsets = [0, 768], sizes = [2, 256], strides = [1, 1]} : vector<2x1024xf32> to vector<2x256xf32>
    %10 = arith.mulf %9, %9 : vector<2x256xf32>
    %11 = arith.addf %8, %10 : vector<2x256xf32>
    %12 = math.rsqrt %11 : vector<2x256xf32>
    %cst = arith.constant 9.99999995E+11 : f32
    %13 = vector.broadcast %cst : f32 to vector<2x256xf32>
    %14 = arith.minimumf %12, %13 : vector<2x256xf32>
    %15 = tpu.concatenate %14, %14, %14, %14 in 1 : vector<2x256xf32>, vector<2x256xf32>, vector<2x256xf32>, vector<2x256xf32> -> vector<2x1024xf32>
    %16 = arith.mulf %0, %15 : vector<2x1024xf32>
    %c0_1 = arith.constant 0 : index
    %c0_2 = arith.constant 0 : index
    %17 = vector.load %arg2[%c0_1, %c0_2] : memref<2x1024xf32, #tpu.memory_space<vmem>>, vector<2x1024xf32>
    tpu.vector_store %arg2[%c0_1, %c0_2], %16 {strides = array<i32>} : memref<2x1024xf32, #tpu.memory_space<vmem>>, vector<2x1024xf32>,
    return
  }
  func.func @transform_0(%arg0: i32) -> (i32, i32) {
    %c0_i32 = arith.constant 0 : i32
    %c0_i32_0 = arith.constant 0 : i32
    return %arg0, %c0_i32 : i32, i32
  }
  func.func @transform_1(%arg0: i32) -> (i32, i32) {
    %c0_i32 = arith.constant 0 : i32
    %c0_i32_0 = arith.constant 0 : i32
    return %arg0, %c0_i32 : i32, i32
  }
}

</mosaic_0001>

<bundles_post_ra>
// kernel: tpu_custom_call.1
= control target key start
LH: loop header
LB: loop body
LE: loop exit
PB: predicated region body
PF: predicated region fallthrough
CT: control target
= control target key end

     0   :  { %6 = vsyncpa [#allocation3], 0  ;;  %s144_s0 = inlined_call_operand.hbm [shape: f32[2,1024], index: 0, kind: input, shape index: {}]   ;;  %s145_s1 = inlined_call_operand.hbm [shape: f32[2,1024], index: 1, kind: output, shape index: {}]  }
   0x1   :  { %7 = vsyncpa [#allocation4], 0  ;;  %s125_s6 = smov [#allocation2]  }
   0x2   :  { %s14_s7 = sshll.u32 %s125_s6, 4  ;;  %s15_s7 = int_to_ptr.vmem [resolvable:$true] %s14_s7 }
   0x3   :  { %s89_s8 = scalar_lea.vmem %s15_s7, 256  ;;  %p94_p1 = scmp.lt.s32.totalorder %s15_s7, %s15_s7 }
   0x4   :  { %p90_p0 = scmp.ne.s32.totalorder %s15_s7, %s89_s8  ;;  %p95_p2 = scmp.lt.s32.totalorder %s89_s8, %s89_s8 }
   0x6   :  { %p96_p3 = por %p95_p2, %p94_p1 }
   0x8   :  { %p97_p4 = pnand %p96_p3, %p90_p0 }
   0xa   :  { %100 = shalt.err (!%p97_p4)
}
   0xb   :  { %17 = dma.hbm_to_vmem [thread:$0]  %s144_s0, 256, %s15_s7, [#allocation3]  }
   0xc   :  { %121 = dma.done.wait [#allocation3], 256  }
   0xd   :  { %122 = vsyncadd [#allocation3], 4294967040  ;;  %v21_v0 = vld [vmem:[#allocation2] sm:$0xff]  ;;  %v22_v1 = vld [vmem:[#allocation2 + $0x8] sm:$0xff]  ;;  %v126_v11 = vmov 1983009808   ;;  %v42_v13 = vlaneseq }
   0xe   :  { %v23_v2 = vmul.f32 %v21_v0, %v21_v0  ;;  %v25_v3 = vrot.slane %v21_v0, 4  ;;  %v32_v4 = vrot.slane %v22_v1, 4  ;;  %v29_v6 = vmul.f32 %v22_v1, %v22_v1  ;;  %s127_s0 = smov [#allocation5]  }
   0xf   :  { %v40_v12 = vunpack.c.l.s4 %v126_v11  ;;  %v43_v15 = vshrl.u32 %v42_v13, 7  ;;  %s67_s11 = sshll.u32 %s127_s0, 4  ;;  %s68_s11 = int_to_ptr.vmem [resolvable:$true] %s67_s11 }
  0x10   :  { %v27_v5 = vmul.f32 %v25_v3, %v25_v3  ;;  %v34_v8 = vmul.f32 %v32_v4, %v32_v4  ;;  %s101_s12 = scalar_lea.vmem %s68_s11, 256  ;;  %p106_p6 = scmp.lt.s32.totalorder %s68_s11, %s68_s11 }
  0x11   :  { %v41_v14 = vunpack.c.0.s8 %v40_v12  ;;  %p102_p5 = scmp.ne.s32.totalorder %s68_s11, %s101_s12  ;;  %p107_p7 = scmp.lt.s32.totalorder %s101_s12, %s101_s12 }
  0x12   :  { %v28_v7 = vadd.f32 %v27_v5, %v23_v2 }
  0x13   :  { %v44_v16 = vsub.s32 %v41_v14, %v43_v15  ;;  %p108_p8 = por %p107_p7, %p106_p6 }
  0x14   :  { %v30_v9 = vadd.f32 %v29_v6, %v28_v7 }
  0x15   :  { %p109_p9 = pnand %p108_p8, %p102_p5 }
  0x16   :  { %v35_v10 = vadd.f32 %v34_v8, %v30_v9 }
  0x18   :  { %79 = vrsqrt.f32 %v35_v10 }
  0x25   :  { %v80_v17 = vpop.eup %79 }
  0x26   :  { %v37_v18 = vmin.f32 %v80_v17, 1e+12 }
  0x28   :  { %v45_v19 = vrot.slane %v37_v18, %v44_v16 }
  0x2a   :  { %v46_v20 = vcombine.high %v45_v19, %v45_v19 }
  0x2c   :  { %v47_v21 = vcombine.low %v45_v19, %v46_v20 }
  0x2e   :  { %v54_v22 = vrot.slane %v47_v21, %v44_v16 }
  0x30   :  { %v55_v23 = vcombine.low %v54_v22, %v54_v22 }
  0x32   :  { %v57_v24 = vmul.f32 %v55_v23, %v21_v0  ;;  %v58_v25 = vmul.f32 %v55_v23, %v22_v1 }
  0x34   :  { %59 = vst [vmem:[#allocation5] sm:$0xff] %v57_v24  ;;  %60 = vst [vmem:[#allocation5 + $0x8] sm:$0xff] %v58_v25 }
  0x35   :  { %112 = shalt.err (!%p109_p9)
}
  0x36   :  { %70 = dma.vmem_to_hbm [thread:$0]  %s68_s11, 256, %s145_s1, [#allocation4]  }
  0x37   :  { %123 = dma.done.wait [#allocation4], 256  }
  0x38   :  { %124 = vsyncadd [#allocation4], 4294967040 }
  0x39   :  { %74 = vsyncpa [#allocation3], 1 }
  0x3a   :  { %75 = vsyncpa [#allocation4], 1 }

</bundles_post_ra>
